<compile_context>
chip_gen: v6e
topology: v6e:2x2x1
jax: 0.10.0
libtpu: 0.0.40
codegen_flags: <defaults>
</compile_context>

<pallas_src>
import functools
import math

import jax
import jax.numpy as jnp
from jax.experimental import pallas as pl
from jax.experimental.pallas import tpu as pltpu


# ----------------------------------------------------------------------------
# Helpers
# ----------------------------------------------------------------------------
def _round_up(x, m):
    return (x + m - 1) // m * m


_LANE = 1024  # lane-dense width for elementwise kernels


# ----------------------------------------------------------------------------
# Pallas kernels
# ----------------------------------------------------------------------------
def _mm_kernel_single(a_ref, w_ref, s_ref, b_ref, *rest, relu, has_res):
    """Single-K-step MXU matmul with fused scale/bias (+residual) (+ReLU)."""
    if has_res:
        r_ref, o_ref = rest
    else:
        (o_ref,) = rest
    acc = jnp.dot(a_ref[...], w_ref[...], preferred_element_type=jnp.float32)
    out = acc * s_ref[...] + b_ref[...]
    if has_res:
        out = out + r_ref[...].astype(jnp.float32)
    if relu:
        out = jnp.maximum(out, 0.0)
    o_ref[...] = out.astype(o_ref.dtype)


def _mm_kernel_multi(a_ref, w_ref, s_ref, b_ref, *rest, relu, has_res):
    """Tiled (tm,tk)@(tk,tn) MXU matmul, K innermost, f32 VMEM accumulator."""
    if has_res:
        r_ref, o_ref, acc_ref = rest
    else:
        o_ref, acc_ref = rest

    k = pl.program_id(2)
    prod = jnp.dot(a_ref[...], w_ref[...], preferred_element_type=jnp.float32)

    @pl.when(k == 0)
    def _():
        acc_ref[...] = prod                       # no explicit zero-init

    @pl.when(k != 0)
    def _():
        acc_ref[...] = acc_ref[...] + prod

    @pl.when(k == pl.num_programs(2) - 1)
    def _():
        out = acc_ref[...] * s_ref[...] + b_ref[...]
        if has_res:
            out = out + r_ref[...].astype(jnp.float32)
        if relu:
            out = jnp.maximum(out, 0.0)
        o_ref[...] = out.astype(o_ref.dtype)


def _ew_kernel(*refs, n_in, relu):
    """Lane-dense elementwise sum of n_in inputs (f32 accumulate) (+ReLU)."""
    in_refs = refs[:n_in]
    o_ref = refs[n_in]
    acc = in_refs[0][...].astype(jnp.float32)
    for r in in_refs[1:]:
        acc = acc + r[...].astype(jnp.float32)
    if relu:
        acc = jnp.maximum(acc, 0.0)
    o_ref[...] = acc.astype(o_ref.dtype)


def _cos_kernel(x_ref, o_ref, *, nchan):
    # cosine similarity against an all-ones vector over the channel axis (axis=1),
    # mapped to (cos + 1) / 2.  Input block is (tr, C, H*W) so H*W is lane-dense.
    x = x_ref[...].astype(jnp.float32)                  # (tr, c, hw)
    num = jnp.sum(x, axis=1)                            # x . ones        -> (tr, hw)
    nrm = jnp.sqrt(jnp.sum(x * x, axis=1))              # ||x||
    denom = jnp.maximum(nrm, 1e-8) * jnp.float32(math.sqrt(nchan))
    o_ref[...] = (num / denom + 1.0) * 0.5


# ----------------------------------------------------------------------------
# Tiled fused matmul wrapper (bf16 MXU operands, f32 accumulate / epilogue)
# ----------------------------------------------------------------------------
def _pallas_matmul(a, w, scale, bias, residual, relu, out_dtype=jnp.bfloat16):
    m, k = a.shape
    n = w.shape[1]

    # tm capped at 256 so larger layers expose >=2 parallel M blocks (v7x 2 TCs);
    # tk up to 1024 so the whole K reduction usually fits a single grid step.
    tm = min(256, _round_up(m, 8))
    tn = min(256, _round_up(n, 128))
    tk = min(1024, _round_up(k, 128))
    mp, kp, np_ = _round_up(m, tm), _round_up(k, tk), _round_up(n, tn)

    a_p = jnp.pad(a.astype(jnp.bfloat16), ((0, mp - m), (0, kp - k)))
    w_p = jnp.pad(w.astype(jnp.bfloat16), ((0, kp - k), (0, np_ - n)))
    s_p = jnp.pad(scale.astype(jnp.float32), (0, np_ - n)).reshape(1, np_)
    b_p = jnp.pad(bias.astype(jnp.float32), (0, np_ - n)).reshape(1, np_)

    gm, gn, gk = mp // tm, np_ // tn, kp // tk
    has_res = residual is not None
    single_k = gk == 1

    args = [a_p, w_p, s_p, b_p]
    if has_res:
        args.append(jnp.pad(residual.astype(jnp.bfloat16),
                            ((0, mp - m), (0, np_ - n))))

    out_bytes = jnp.dtype(out_dtype).itemsize
    cost = pl.CostEstimate(
        flops=2 * mp * kp * np_,
        transcendentals=0,
        bytes_accessed=(mp * kp * 2 + kp * np_ * 2 + mp * np_ * out_bytes
                        + (mp * np_ * 2 if has_res else 0) + 2 * np_ * 4),
    )

    if single_k:
        grid = (gm, gn)
        in_specs = [
            pl.BlockSpec((tm, tk), lambda i, j: (i, 0)),
            pl.BlockSpec((tk, tn), lambda i, j: (0, j)),
            pl.BlockSpec((1, tn), lambda i, j: (0, j)),
            pl.BlockSpec((1, tn), lambda i, j: (0, j)),
        ]
        if has_res:
            in_specs.append(pl.BlockSpec((tm, tn), lambda i, j: (i, j)))
        out_specs = pl.BlockSpec((tm, tn), lambda i, j: (i, j))
        kernel = functools.partial(_mm_kernel_single, relu=relu, has_res=has_res)
        scratch = []
        sem = ("parallel", "parallel")
    else:
        grid = (gm, gn, gk)
        in_specs = [
            pl.BlockSpec((tm, tk), lambda i, j, kk: (i, kk)),
            pl.BlockSpec((tk, tn), lambda i, j, kk: (kk, j)),
            pl.BlockSpec((1, tn), lambda i, j, kk: (0, j)),
            pl.BlockSpec((1, tn), lambda i, j, kk: (0, j)),
        ]
        if has_res:
            in_specs.append(pl.BlockSpec((tm, tn), lambda i, j, kk: (i, j)))
        out_specs = pl.BlockSpec((tm, tn), lambda i, j, kk: (i, j))
        kernel = functools.partial(_mm_kernel_multi, relu=relu, has_res=has_res)
        scratch = [pltpu.VMEM((tm, tn), jnp.float32)]
        sem = ("parallel", "parallel", "arbitrary")

    out = pl.pallas_call(
        kernel,
        out_shape=jax.ShapeDtypeStruct((mp, np_), out_dtype),
        grid=grid,
        in_specs=in_specs,
        out_specs=out_specs,
        scratch_shapes=scratch,
        compiler_params=pltpu.CompilerParams(
            dimension_semantics=sem,
            vmem_limit_bytes=32 * 1024 * 1024,   # small tiles; fits v7x's 64 MiB too
        ),
        cost_estimate=cost,
    )(*args)
    return out[:m, :n]


# ----------------------------------------------------------------------------
# Lane-dense elementwise fuse-sum (+ReLU)
# ----------------------------------------------------------------------------
def _ew_apply(arrs, relu):
    shape = arrs[0].shape
    dtype = arrs[0].dtype
    total = arrs[0].size
    rows = -(-total // _LANE)
    tr = min(512, _round_up(rows, 8))
    rows_pad = _round_up(rows, tr)
    need_pad = rows_pad * _LANE != total
    padded = []
    for a in arrs:
        flat = a.reshape(-1)
        if need_pad:
            flat = jnp.pad(flat, (0, rows_pad * _LANE - total))
        padded.append(flat.reshape(rows_pad, _LANE))
    out = pl.pallas_call(
        functools.partial(_ew_kernel, n_in=len(arrs), relu=relu),
        out_shape=jax.ShapeDtypeStruct((rows_pad, _LANE), dtype),
        grid=(rows_pad // tr,),
        in_specs=[pl.BlockSpec((tr, _LANE), lambda i: (i, 0))] * len(arrs),
        out_specs=pl.BlockSpec((tr, _LANE), lambda i: (i, 0)),
        compiler_params=pltpu.CompilerParams(dimension_semantics=("parallel",)),
    )(*padded)
    return out.reshape(-1)[:total].reshape(shape)


@functools.partial(jax.jit, static_argnames=("relu",))
def fuse_sum(arrs, *, relu):
    return _ew_apply(list(arrs), relu)


# ----------------------------------------------------------------------------
# Op wrappers (glue: padding / im2col / reshapes in XLA, compute in Pallas)
# ----------------------------------------------------------------------------
@functools.partial(jax.jit,
                   static_argnames=("stride", "pad", "pad_mode", "relu", "out_dtype"))
def conv3d_unit(x, w, scale, bias, residual=None, *, stride, pad, pad_mode, relu,
                out_dtype=jnp.bfloat16):
    """Conv3d (+folded BN / bias) (+fused residual) (+ReLU).

    x: (N, D, H, W, Cin) channels-last; w: (Cout, Cin, kd, kh, kw);
    residual (optional): (N, Do, Ho, Wo, Cout), added before the ReLU.
    """
    cout, cin, kd, kh, kw = w.shape
    x = x.astype(jnp.bfloat16)          # bf16 operands for the MXU / halved HBM traffic
    if pad > 0:
        mode = "edge" if pad_mode == "replicate" else "constant"
        x = jnp.pad(x, ((0, 0), (pad, pad), (pad, pad), (pad, pad), (0, 0)), mode=mode)
    n, d, h, ww, _ = x.shape
    do = (d - kd) // stride + 1
    ho = (h - kh) // stride + 1
    wo = (ww - kw) // stride + 1

    if kd == kh == kw == 1 and stride == 1:
        patches = x.reshape(n * do * ho * wo, cin)
    else:
        cols = []
        for a in range(kd):
            for b in range(kh):
                for c in range(kw):
                    cols.append(x[:, a:a + stride * do:stride,
                                     b:b + stride * ho:stride,
                                     c:c + stride * wo:stride, :])
        patches = jnp.stack(cols, axis=-1)                       # (N,Do,Ho,Wo,Cin,k^3)
        patches = patches.reshape(n * do * ho * wo, cin * kd * kh * kw)

    w_mat = jnp.transpose(w, (1, 2, 3, 4, 0)).reshape(cin * kd * kh * kw, cout)
    res_mat = None if residual is None else residual.reshape(n * do * ho * wo, cout)
    out = _pallas_matmul(patches, w_mat, scale, bias, res_mat, relu, out_dtype)
    return out.reshape(n, do, ho, wo, cout)


@jax.jit
def deconv2x_unit(x, w, scale, bias):
    """ConvTranspose3d(k=2, s=2) + folded BN + ReLU.  x channels-last, w: (Cin,Cout,2,2,2)."""
    n, d, h, ww, cin = x.shape
    cout = w.shape[1]
    xm = x.reshape(n * d * h * ww, cin)
    wm = w.reshape(cin, cout * 8)
    sc = jnp.repeat(scale, 8)
    bi = jnp.repeat(bias, 8)
    y = _pallas_matmul(xm, wm, sc, bi, None, True)               # bf16 out halves shuffle
    y = y.reshape(n, d, h, ww, cout, 2, 2, 2)
    y = y.transpose(0, 1, 5, 2, 6, 3, 7, 4).reshape(n, 2 * d, 2 * h, 2 * ww, cout)
    return y


@jax.jit
def cosine_head(x_feat):
    """(cosine_similarity(x, ones, dim=channel) + 1)/2 with a lane-dense H*W axis."""
    n, d, h, w, c = x_feat.shape
    rows, hw = n * d, h * w
    xm = jnp.transpose(x_feat.reshape(rows, hw, c), (0, 2, 1))   # (rows, c, hw)
    tr = min(128, _round_up(rows, 8))
    rows_pad = _round_up(rows, tr)
    if rows_pad != rows:
        xm = jnp.pad(xm, ((0, rows_pad - rows), (0, 0), (0, 0)))
    out = pl.pallas_call(
        functools.partial(_cos_kernel, nchan=c),
        out_shape=jax.ShapeDtypeStruct((rows_pad, hw), jnp.float32),
        grid=(rows_pad // tr,),
        in_specs=[pl.BlockSpec((tr, c, hw), lambda i: (i, 0, 0))],
        out_specs=pl.BlockSpec((tr, hw), lambda i: (i, 0)),
        compiler_params=pltpu.CompilerParams(dimension_semantics=("parallel",)),
    )(xm)
    return out[:rows].reshape(n, d, h, w)


def nearest_up(x, factor):
    f = int(factor)
    x = jnp.repeat(x, f, axis=1)
    x = jnp.repeat(x, f, axis=2)
    x = jnp.repeat(x, f, axis=3)
    return x


def trilinear_resize(x, size):
    # matches F.interpolate(mode='trilinear', align_corners=False) for upsampling
    n, c = x.shape[0], x.shape[-1]
    return jax.image.resize(x, (n,) + tuple(size) + (c,), method="trilinear")


def _lerp_axis_align_corners(x, axis, out_size):
    in_size = x.shape[axis]
    if out_size == in_size:
        return x
    if in_size == 1:
        reps = [1] * x.ndim
        reps[axis] = out_size
        return jnp.tile(x, reps)
    pos = jnp.arange(out_size, dtype=jnp.float32) * ((in_size - 1) / max(out_size - 1, 1))
    lo = jnp.floor(pos).astype(jnp.int32)
    hi = jnp.minimum(lo + 1, in_size - 1)
    frac = pos - lo.astype(jnp.float32)
    xlo = jnp.take(x, lo, axis=axis)
    xhi = jnp.take(x, hi, axis=axis)
    bshape = [1] * x.ndim
    bshape[axis] = out_size
    frac = frac.reshape(bshape)
    return xlo * (1.0 - frac) + xhi * frac


def trilinear_align_corners(x, size):
    # F.interpolate(mode='trilinear', align_corners=True), x in NCDHW.
    for axis, s in zip((2, 3, 4), size):
        x = _lerp_axis_align_corners(x, axis, int(s))
    return x


# ----------------------------------------------------------------------------
# Deterministic parameter construction (synthetic weights, BN folded)
# ----------------------------------------------------------------------------
class PRNG:
    def __init__(self, seed):
        self._key = jax.random.PRNGKey(seed)

    def next(self):
        self._key, sub = jax.random.split(self._key)
        return sub


def _bn_fold(rng, cout, conv_bias):
    eps = 1e-5
    gamma = 1.0 + 0.1 * jax.random.normal(rng.next(), (cout,), jnp.float32)
    beta = 0.05 * jax.random.normal(rng.next(), (cout,), jnp.float32)
    mean = jnp.zeros((cout,), jnp.float32)
    var = jnp.ones((cout,), jnp.float32)
    scale = gamma / jnp.sqrt(var + eps)
    bias = beta + (conv_bias - mean) * scale
    return scale, bias


def make_conv_unit(rng, cin, cout, k, conv_bias=False, with_bn=True):
    fan = cin * k ** 3
    w = jax.random.normal(rng.next(), (cout, cin, k, k, k), jnp.float32) * (0.3 * math.sqrt(2.0 / fan))
    cb = (0.01 * jax.random.normal(rng.next(), (cout,), jnp.float32)) if conv_bias \
        else jnp.zeros((cout,), jnp.float32)
    if with_bn:
        scale, bias = _bn_fold(rng, cout, cb)
    else:
        scale, bias = jnp.ones((cout,), jnp.float32), cb
    return {"w": w, "scale": scale, "bias": bias}


def make_deconv_unit(rng, cin, cout):
    fan = cin * 8
    w = jax.random.normal(rng.next(), (cin, cout, 2, 2, 2), jnp.float32) * (0.3 * math.sqrt(2.0 / fan))
    cb = 0.01 * jax.random.normal(rng.next(), (cout,), jnp.float32)
    scale, bias = _bn_fold(rng, cout, cb)
    return {"w": w, "scale": scale, "bias": bias}


def conv_u(x, u, *, stride=1, pad=1, relu=False, pad_mode="zeros", residual=None,
           out_dtype=jnp.bfloat16):
    return conv3d_unit(x, u["w"], u["scale"], u["bias"], residual=residual,
                       stride=stride, pad=pad, pad_mode=pad_mode, relu=relu,
                       out_dtype=out_dtype)


# ----------------------------------------------------------------------------
# Blocks (residual add + final ReLU fused into the last conv's matmul epilogue)
# ----------------------------------------------------------------------------
def make_basic_block(rng, inplanes, planes):
    return {
        "c1": make_conv_unit(rng, inplanes, planes, 3),
        "c2": make_conv_unit(rng, planes, planes, 3),
        "res": make_conv_unit(rng, inplanes, planes, 1, conv_bias=False, with_bn=False)
        if inplanes != planes else None,
    }


def basic_block(p, x):
    residual = x if p["res"] is None else conv_u(x, p["res"], stride=1, pad=0, relu=False)
    out = conv_u(x, p["c1"], stride=1, pad=1, relu=True)
    out = conv_u(out, p["c2"], stride=1, pad=1, relu=True, residual=residual)
    return out


def make_bottleneck(rng, inplanes, planes, downsample=False):
    exp = 4
    return {
        "c1": make_conv_unit(rng, inplanes, planes, 1),
        "c2": make_conv_unit(rng, planes, planes, 3),
        "c3": make_conv_unit(rng, planes, planes * exp, 1),
        "down": make_conv_unit(rng, inplanes, planes * exp, 1) if downsample else None,
    }


def bottleneck(p, x):
    residual = x if p["down"] is None else conv_u(x, p["down"], pad=0, relu=False)
    out = conv_u(x, p["c1"], pad=0, relu=True)
    out = conv_u(out, p["c2"], pad=1, relu=True)
    out = conv_u(out, p["c3"], pad=0, relu=True, residual=residual)
    return out


def make_stage_module(rng, stage, output_branches, c):
    branches = []
    for i in range(stage):
        w = c * 2 ** i
        branches.append([make_basic_block(rng, w, w) for _ in range(4)])
    fuse = []
    for i in range(output_branches):
        row = []
        for j in range(stage):
            if i == j:
                row.append(None)
            elif i < j:
                row.append({"type": "up",
                            "conv": make_conv_unit(rng, c * 2 ** j, c * 2 ** i, 1),
                            "factor": 2 ** (j - i)})
            else:
                ops = []
                for _ in range(i - j - 1):
                    ops.append({"conv": make_conv_unit(rng, c * 2 ** j, c * 2 ** j, 3), "relu": True})
                ops.append({"conv": make_conv_unit(rng, c * 2 ** j, c * 2 ** i, 3), "relu": False})
                row.append({"type": "down", "ops": ops})
        fuse.append(row)
    return {"branches": branches, "fuse": fuse, "stage": stage, "out": output_branches}


def stage_module(p, xs):
    xs = list(xs)
    for bi, blocks in enumerate(p["branches"]):
        t = xs[bi]
        for blk in blocks:
            t = basic_block(blk, t)
        xs[bi] = t
    fused = []
    for i in range(p["out"]):
        pre_terms = []    # identity + upsampled terms (cannot fuse into a conv epilogue)
        down_paths = []   # terms whose last op is a stride-2 conv -> fuse add+ReLU there
        for j in range(p["stage"]):
            f = p["fuse"][i][j]
            if f is None:
                pre_terms.append(xs[j])
            elif f["type"] == "up":
                y = conv_u(xs[j], f["conv"], stride=1, pad=0, relu=False)
                pre_terms.append(nearest_up(y, f["factor"]))
            else:
                down_paths.append(f)
        if not down_paths:
            fused.append(fuse_sum(tuple(pre_terms), relu=True))
            continue
        # running partial sum of the non-down terms (single kernel, no ReLU yet)
        if len(pre_terms) == 1:
            partial = pre_terms[0]
        else:
            partial = fuse_sum(tuple(pre_terms), relu=False)
        # chain the partial sum through each down path's final conv epilogue;
        # the very last conv also applies the fused ReLU (== relu(sum of all terms)).
        for pi, f in enumerate(down_paths):
            last_path = pi == len(down_paths) - 1
            y = xs[p["fuse"][i].index(f)] if False else None  # (unused; kept for clarity)
            # recover the source branch tensor
            src_j = None
            for j in range(p["stage"]):
                if p["fuse"][i][j] is f:
                    src_j = j
                    break
            y = xs[src_j]
            ops = f["ops"]
            for oi, op in enumerate(ops):
                if oi == len(ops) - 1:
                    y = conv_u(y, op["conv"], stride=2, pad=1,
                               relu=last_path, residual=partial)
                    partial = y
                else:
                    y = conv_u(y, op["conv"], stride=2, pad=1, relu=op["relu"])
        fused.append(partial)
    return fused


# ----------------------------------------------------------------------------
# HRNet backbone
# ----------------------------------------------------------------------------
def make_hrnet(rng, base=4):
    c = base
    p = {"c": c}
    p["input_layer"] = make_basic_block(rng, 1, c)
    p["cb1_conv"] = make_conv_unit(rng, c, 64, 3)
    p["cb1_block"] = make_basic_block(rng, 64, 64)
    p["cb2_conv"] = make_conv_unit(rng, 64, 64, 3)
    p["layer1"] = [make_bottleneck(rng, 64, 64, downsample=True)] + \
                  [make_bottleneck(rng, 256, 64) for _ in range(3)]
    p["trans1_0"] = make_conv_unit(rng, 256, c, 3)
    p["trans1_1"] = make_conv_unit(rng, 256, 2 * c, 3)
    p["stage2"] = [make_stage_module(rng, 2, 2, c)]
    p["trans2"] = make_conv_unit(rng, 2 * c, 4 * c, 3)
    p["stage3"] = [make_stage_module(rng, 3, 3, c) for _ in range(4)]
    p["stage4"] = [make_stage_module(rng, 3, 3, c) for _ in range(4)]
    p["fu1_conv"] = make_conv_unit(rng, 7 * c, 4 * c, 3, conv_bias=True)
    p["fu1_deconv"] = make_deconv_unit(rng, 4 * c, 2 * c)
    p["fu1_block"] = make_basic_block(rng, 2 * c, 2 * c)
    p["fu2_conv"] = make_conv_unit(rng, 2 * c + 64, 2 * c, 3, conv_bias=True)
    p["fu2_deconv"] = make_deconv_unit(rng, 2 * c, c)
    p["fl_block1"] = make_basic_block(rng, 2 * c, c)
    p["fl_block2"] = make_basic_block(rng, c, c)
    p["fl_conv"] = make_conv_unit(rng, c, c, 3, conv_bias=True, with_bn=False)
    # note: self.last_layer exists in __init__ but is never used in forward(); skipped.
    return p


def hrnet_forward(p, x):
    """Backbone.  x: (N, 1, D, H, W) NCDHW.  Returns (feat NCDHW, result NCDHW)."""
    x = jnp.transpose(x, (0, 2, 3, 4, 1))               # -> channels-last
    # input_layer
    x_skip1 = basic_block(p["input_layer"], x)
    # conv_block1
    t = conv_u(x_skip1, p["cb1_conv"], stride=2, pad=1, relu=True)
    x_skip2 = basic_block(p["cb1_block"], t)
    # conv_block2
    t = conv_u(x_skip2, p["cb2_conv"], stride=2, pad=1, relu=True)
    # layer1
    for blk in p["layer1"]:
        t = bottleneck(blk, t)
    # transition1
    xs = [conv_u(t, p["trans1_0"], stride=1, pad=1, relu=True),
          conv_u(t, p["trans1_1"], stride=2, pad=1, relu=True)]
    # stage2
    for sm in p["stage2"]:
        xs = stage_module(sm, xs)
    # transition2 (branches 0,1 identity; new branch from x[-1])
    xs = [xs[0], xs[1], conv_u(xs[-1], p["trans2"], stride=2, pad=1, relu=True)]
    # stage3 / stage4
    for sm in p["stage3"]:
        xs = stage_module(sm, xs)
    for sm in p["stage4"]:
        xs = stage_module(sm, xs)
    # multi-resolution fusion
    d0, h0, w0 = xs[0].shape[1:4]
    x1i = trilinear_resize(xs[1], (d0, h0, w0))
    x2i = trilinear_resize(xs[2], (d0, h0, w0))
    t = jnp.concatenate([xs[0], x1i, x2i], axis=-1)
    # fuse_up_layer1
    t = conv_u(t, p["fu1_conv"], stride=1, pad=1, relu=True)
    t = deconv2x_unit(t, p["fu1_deconv"]["w"], p["fu1_deconv"]["scale"], p["fu1_deconv"]["bias"])
    t = basic_block(p["fu1_block"], t)
    # skip connection 2
    t = jnp.concatenate([x_skip2, t], axis=-1)
    # fuse_up_layer2
    t = conv_u(t, p["fu2_conv"], stride=1, pad=1, relu=True)
    t = deconv2x_unit(t, p["fu2_deconv"]["w"], p["fu2_deconv"]["scale"], p["fu2_deconv"]["bias"])
    # skip connection 1
    t = jnp.concatenate([x_skip1, t], axis=-1)
    # fuse_layer
    t = basic_block(p["fl_block1"], t)
    t = basic_block(p["fl_block2"], t)
    # keep f32 only for the final conv feeding the cosine head / returned feature
    x_feat = conv_u(t, p["fl_conv"], stride=1, pad=1, relu=False, pad_mode="replicate",
                    out_dtype=jnp.float32)
    # (cosine_similarity(x_feat, ones, dim=channel) + 1) / 2, with added channel dim
    cos = cosine_head(x_feat)                            # (N, D, H, W)
    x_feat_ncdhw = jnp.transpose(x_feat, (0, 4, 1, 2, 3))
    cos_ncdhw = cos[:, None, :, :, :]
    return x_feat_ncdhw, cos_ncdhw


# ----------------------------------------------------------------------------
# PixPro forward (Encoder with coord=None -> only `result` is used)
# ----------------------------------------------------------------------------
def pixpro_forward(params, view1, logCube1):
    t_sz, h_sz, w_sz = logCube1.shape[2:]
    feat, result = hrnet_forward(params, view1)
    # Encoder.forward: result -> trilinear(align_corners=True) to (orgt=T, H, W);
    # (feat is also interpolated there but discarded since coord is None)
    result = trilinear_align_corners(result, (t_sz, view1.shape[3], view1.shape[4]))
    # PixPro.forward: second interpolation to logCube1's (T, H, W)
    result = trilinear_align_corners(result, (t_sz, h_sz, w_sz))
    return feat, result


# ----------------------------------------------------------------------------
if __name__ == "__main__":
    base = 4                       # small synthetic config (PyTorch default is 32)
    rng = PRNG(0)
    params = make_hrnet(rng, base=base)

    key = jax.random.PRNGKey(0)
    k1, k2 = jax.random.split(key)
    view1 = jax.random.normal(k1, (1, 1, 16, 16, 16), jnp.float32)
    logCube1 = jax.random.normal(k2, (1, 1, 16, 16, 16), jnp.float32)

    x_feat, result = pixpro_forward(params, view1, logCube1)
    (x_feat, result) = jax.block_until_ready((x_feat, result))

    assert x_feat.shape == (1, base, 16, 16, 16), x_feat.shape
    assert result.shape == (1, 1, 16, 16, 16), result.shape
    assert bool(jnp.all(jnp.isfinite(x_feat))) and bool(jnp.all(jnp.isfinite(result)))
    print("KERNEL_OK")
</pallas_src>

<mosaic_0001>
module attributes {stable_mosaic.version = 11 : i64} {
  func.func @_mm_kernel_single(%arg0: i32, %arg1: i32, %arg2: memref<256x128xbf16, #tpu.memory_space<vmem>>, %arg3: memref<128x128xbf16, #tpu.memory_space<vmem>>, %arg4: memref<1x128xf32, #tpu.memory_space<vmem>>, %arg5: memref<1x128xf32, #tpu.memory_space<vmem>>, %arg6: memref<256x128xbf16, #tpu.memory_space<vmem>>) attributes {dimension_semantics = [#tpu.dimension_semantics<parallel>, #tpu.dimension_semantics<parallel>], iteration_bounds = array<i64: 16, 1>, scalar_prefetch = 0 : i64, scratch_operands = 0 : i64, tpu.core_type = #tpu.core_type<tc>, window_params = [{transform_indices = @transform_0, window_bounds = array<i64: 256, 128>}, {transform_indices = @transform_1, window_bounds = array<i64: 128, 128>}, {transform_indices = @transform_2, window_bounds = array<i64: 1, 128>}, {transform_indices = @transform_3, window_bounds = array<i64: 1, 128>}, {transform_indices = @transform_4, window_bounds = array<i64: 256, 128>}]} {
    %c0 = arith.constant 0 : index
    %c0_0 = arith.constant 0 : index
    %0 = vector.load %arg2[%c0, %c0_0] : memref<256x128xbf16, #tpu.memory_space<vmem>>, vector<256x128xbf16>
    %c0_1 = arith.constant 0 : index
    %c0_2 = arith.constant 0 : index
    %1 = vector.load %arg3[%c0_1, %c0_2] : memref<128x128xbf16, #tpu.memory_space<vmem>>, vector<128x128xbf16>
    %cst = arith.constant dense<0.000000e+00> : vector<256x128xf32>
    %2 = tpu.matmul %0, %1, %cst {dimension_numbers = #tpu.dot_dimension_numbers<[1], [0], [0], [1], [0, 0, 1, 1], [], []>} : vector<256x128xbf16>, vector<128x128xbf16>, vector<256x128xf32> -> vector<256x128xf32>
    %c0_3 = arith.constant 0 : index
    %c0_4 = arith.constant 0 : index
    %3 = vector.load %arg4[%c0_3, %c0_4] : memref<1x128xf32, #tpu.memory_space<vmem>>, vector<1x128xf32>
    %4 = vector.broadcast %3 : vector<1x128xf32> to vector<256x128xf32>
    %5 = arith.mulf %2, %4 : vector<256x128xf32>
    %c0_5 = arith.constant 0 : index
    %c0_6 = arith.constant 0 : index
    %6 = vector.load %arg5[%c0_5, %c0_6] : memref<1x128xf32, #tpu.memory_space<vmem>>, vector<1x128xf32>
    %7 = vector.broadcast %6 : vector<1x128xf32> to vector<256x128xf32>
    %8 = arith.addf %5, %7 : vector<256x128xf32>
    %9 = arith.truncf %8 : vector<256x128xf32> to vector<256x128xbf16>
    %c0_7 = arith.constant 0 : index
    %c0_8 = arith.constant 0 : index
    %10 = vector.load %arg6[%c0_7, %c0_8] : memref<256x128xbf16, #tpu.memory_space<vmem>>, vector<256x128xbf16>
    tpu.vector_store %arg6[%c0_7, %c0_8], %9 {strides = array<i32>} : memref<256x128xbf16, #tpu.memory_space<vmem>>, vector<256x128xbf16>,
    return
  }
  func.func @transform_0(%arg0: i32, %arg1: i32) -> (i32, i32) {
    %c0_i32 = arith.constant 0 : i32
    %c0_i32_0 = arith.constant 0 : i32
    return %arg0, %c0_i32 : i32, i32
  }
  func.func @transform_1(%arg0: i32, %arg1: i32) -> (i32, i32) {
    %c0_i32 = arith.constant 0 : i32
    %c0_i32_0 = arith.constant 0 : i32
    return %c0_i32, %arg1 : i32, i32
  }
  func.func @transform_2(%arg0: i32, %arg1: i32) -> (i32, i32) {
    %c0_i32 = arith.constant 0 : i32
    %c0_i32_0 = arith.constant 0 : i32
    return %c0_i32, %arg1 : i32, i32
  }
  func.func @transform_3(%arg0: i32, %arg1: i32) -> (i32, i32) {
    %c0_i32 = arith.constant 0 : i32
    %c0_i32_0 = arith.constant 0 : i32
    return %c0_i32, %arg1 : i32, i32
  }
  func.func @transform_4(%arg0: i32, %arg1: i32) -> (i32, i32) {
    %c0_i32 = arith.constant 0 : i32
    return %arg0, %arg1 : i32, i32
  }
}

</mosaic_0001>

<bundles_post_ra>
// kernel: conv3d_unit.1
= control target key start
LH: loop header
LB: loop body
LE: loop exit
PB: predicated region body
PF: predicated region fallthrough
CT: control target
= control target key end

     0   :  { %s1356_s15 = smov 0   ;;  %s1358_s16 = smov 0   ;;  %s1530_s0 = inlined_call_operand.vmem [shape: bf16[4096,128], index: 0, kind: input, shape index: {}]   ;;  %s1531_s1 = inlined_call_operand.vmem [shape: bf16[128,128], index: 1, kind: input, shape index: {}]   ;;  %s1532_s2 = inlined_call_operand.vmem [shape: f32[1,128], index: 2, kind: input, shape index: {}]   ;;  %s1533_s3 = inlined_call_operand.vmem [shape: f32[1,128], index: 3, kind: input, shape index: {}]   ;;  %s1534_s4 = inlined_call_operand.vmem [shape: bf16[4096,128], index: 4, kind: output, shape index: {}]  }
   0x1   :  { %s1360_s17 = smov 0  }
   0x2 LB: > { %s26_s18 = sadd.s32 1, %s1325_s16  ;;  %p979_p0 = scmp.ge.s32.totalorder %s1329_s17, 1  ;;  %s1329_s17 = sphi %s1360_s17, %s14_s17   ;;  %s1325_s16 = sphi %s1358_s16, %s1536_s16   ;;  %s1321_s15 = sphi %s1356_s15, %s1535_s15  }
   0x3   : > { %p28_p1 = scmp.ge.s32.totalorder %s26_s18, 16  ;;  %p202_p2 = scmp.lt.s32.totalorder %s1329_s17, 17 }
   0x5   : > { %s1538_s18 = smov (%p28_p1, %s26_s18), 0  ;;  %p203_p3 = pnand %p979_p0, %p202_p2 }
   0x6   : > { %s980_s21 = sshll.u32 (!%p203_p3), %s1321_s15, 5 }
   0x7   : > { %206 = sbr.rel (%p203_p3) target bundleno = 275 (0x113), region = 36  ;;  %p242_p4 = scmp.lt.s32.totalorder (!%p203_p3), %s980_s21, 511 }
   0xc   : > { %v1283_v0 = vld [vmem:[%s1531_s1 + $0x38] sm:$0xff]   ;;  %v1284_v1 = vld [vmem:[%s1531_s1 + $0x30] sm:$0xff]   ;;  %s1540_s21 = smov (!%p242_p4, %s980_s21), 511  ;;  %v1285_v2 = vld [vmem:[%s1531_s1 + $0x28] sm:$0xff]  }
   0xd   : > { %1195 = vmatprep.subr.bf16.mxu0 %v1283_v0  ;;  %1243 = vmatprep.subr.bf16.mxu1 %v1283_v0  ;;  %s981_s26 = sshll.u32 %s1540_s21, 2  ;;  %v1286_v3 = vld [vmem:[%s1531_s1 + $0x20] sm:$0xff]   ;;  %v1287_v6 = vld [vmem:[%s1531_s1 + $0x18] sm:$0xff]   ;;  %v1288_v7 = vld [vmem:[%s1531_s1 + $0x10] sm:$0xff]  }
   0xe   : > { %1196 = vmatpush3.bf16.msra.mxu0 %v1283_v0  ;;  %1251 = vmatpush3.bf16.msra.mxu1 %v1283_v0  ;;  %s1391_s29 = scalar_lea.vmem %s1530_s0, %s981_s26  ;;  %v1289_v8 = vld [vmem:[%s1531_s1 + $0x8] sm:$0xff]   ;;  %v1290_v9 = vld [vmem:[%s1531_s1] sm:$0xff]   ;;  %s1453_s24 = scalar_lea.vmem %s1534_s4, %s981_s26 }
   0xf   : > { %1197 = vmatprep.subr.bf16.mxu0 %v1284_v1  ;;  %1244 = vmatprep.subr.bf16.mxu1 %v1284_v1  ;;  %v1291_v4 = vld [vmem:[%s1391_s29] sm:$0xff]   ;;  %v1293_v10 = vld [vmem:[%s1391_s29 + $0x8] sm:$0xff]   ;;  %v1295_v12 = vld [vmem:[%s1391_s29 + $0x10] sm:$0xff]  }
  0x10   : > { %v1292_v5 = vld [vmem:[%s1391_s29 + $0x40] sm:$0xff]   ;;  %1211 = vmatprep.mubr.bf16.mxu0 %v1291_v4  ;;  %v1294_v11 = vld [vmem:[%s1391_s29 + $0x48] sm:$0xff]   ;;  %v1296_v13 = vld [vmem:[%s1391_s29 + $0x50] sm:$0xff]  }
  0x11   : > { %1227 = vmatprep.mubr.bf16.mxu1 %v1292_v5  ;;  %v1297_v14 = vld [vmem:[%s1391_s29 + $0x18] sm:$0xff]   ;;  %v1299_v16 = vld [vmem:[%s1391_s29 + $0x20] sm:$0xff]   ;;  %v1301_v18 = vld [vmem:[%s1391_s29 + $0x28] sm:$0xff]  }
  0x12   : > { %1198 = vmatpush3.bf16.msra.mxu0 %v1284_v1  ;;  %1252 = vmatpush3.bf16.msra.mxu1 %v1284_v1  ;;  %v1298_v15 = vld [vmem:[%s1391_s29 + $0x58] sm:$0xff]   ;;  %v1300_v17 = vld [vmem:[%s1391_s29 + $0x60] sm:$0xff]   ;;  %v1302_v19 = vld [vmem:[%s1391_s29 + $0x68] sm:$0xff]  }
  0x13   : > { %1199 = vmatprep.subr.bf16.mxu0 %v1285_v2  ;;  %1245 = vmatprep.subr.bf16.mxu1 %v1285_v2  ;;  %v1303_v20 = vld [vmem:[%s1391_s29 + $0x30] sm:$0xff]   ;;  %v1305_v22 = vld [vmem:[%s1391_s29 + $0x38] sm:$0xff]   ;;  %v1427_v24 = vld [vmem:[%s1532_s2] ss:$0 sm:$0xff] }
  0x14   : > { %v1304_v21 = vld [vmem:[%s1391_s29 + $0x70] sm:$0xff]   ;;  %v1306_v23 = vld [vmem:[%s1391_s29 + $0x78] sm:$0xff]   ;;  %v1434_v31 = vld [vmem:[%s1533_s3] ss:$0 sm:$0xff] }
  0x16   : > { %1200 = vmatpush3.bf16.msra.mxu0 %v1285_v2  ;;  %1253 = vmatpush3.bf16.msra.mxu1 %v1285_v2 }
  0x17   : > { %1201 = vmatprep.subr.bf16.mxu0 %v1286_v3  ;;  %1246 = vmatprep.subr.bf16.mxu1 %v1286_v3 }
  0x1a   : > { %1202 = vmatpush3.bf16.msra.mxu0 %v1286_v3  ;;  %1254 = vmatpush3.bf16.msra.mxu1 %v1286_v3 }
  0x1b   : > { %1203 = vmatprep.subr.bf16.mxu0 %v1287_v6  ;;  %1247 = vmatprep.subr.bf16.mxu1 %v1287_v6 }
  0x1e   : > { %1204 = vmatpush3.bf16.msra.mxu0 %v1287_v6  ;;  %1255 = vmatpush3.bf16.msra.mxu1 %v1287_v6 }
  0x1f   : > { %1205 = vmatprep.subr.bf16.mxu0 %v1288_v7  ;;  %1248 = vmatprep.subr.bf16.mxu1 %v1288_v7 }
  0x22   : > { %1206 = vmatpush3.bf16.msra.mxu0 %v1288_v7  ;;  %1256 = vmatpush3.bf16.msra.mxu1 %v1288_v7 }
  0x23   : > { %1207 = vmatprep.subr.bf16.mxu0 %v1289_v8  ;;  %1249 = vmatprep.subr.bf16.mxu1 %v1289_v8 }
  0x26   : > { %1208 = vmatpush3.bf16.msra.mxu0 %v1289_v8  ;;  %1257 = vmatpush3.bf16.msra.mxu1 %v1289_v8 }
  0x27   : > { %1209 = vmatprep.subr.bf16.mxu0 %v1290_v9  ;;  %1250 = vmatprep.subr.bf16.mxu1 %v1290_v9 }
  0x2a   : > { %1210 = vmatpush3.bf16.msra.mxu0 %v1290_v9  ;;  %1258 = vmatpush3.bf16.msra.mxu1 %v1290_v9 }
  0x2d   : > { %1212 = vmatmul.mubr.bf16.vlgmr.msra.gmra.mxu0 %v1293_v10  ;;  %1228 = vmatmul.mubr.bf16.vlgmr.msra.gmra.mxu1 %v1294_v11 }
  0x2e   : > { %1215 = vmatprep.mubr.bf16.mxu0 %v1295_v12  ;;  %1231 = vmatprep.mubr.bf16.mxu1 %v1296_v13 }
  0x35   : > { %1216 = vmatmul.mubr.bf16.gmra.mxu0 %v1297_v14  ;;  %1232 = vmatmul.mubr.bf16.gmra.mxu1 %v1298_v15 }
  0x36   : > { %1219 = vmatprep.mubr.bf16.mxu0 %v1299_v16  ;;  %1235 = vmatprep.mubr.bf16.mxu1 %v1300_v17 }
  0x3d   : > { %1220 = vmatmul.mubr.bf16.gmra.mxu0 %v1301_v18  ;;  %1236 = vmatmul.mubr.bf16.gmra.mxu1 %v1302_v19 }
  0x3e   : > { %1223 = vmatprep.mubr.bf16.mxu0 %v1303_v20  ;;  %1239 = vmatprep.mubr.bf16.mxu1 %v1304_v21 }
  0x45   : > { %1224 = vmatmul.mubr.bf16.gmra.mxu0 %v1305_v22  ;;  %1240 = vmatmul.mubr.bf16.gmra.mxu1 %v1306_v23 }
  0xed   : > { %v1213_v25 = vpop.f32.mrf.mxu0  ;;  %v1229_v26 = vpop.f32.mrf.mxu1 }
  0xee   : > { %v629_v27 = vmul.f32 %v1213_v25, %v1427_v24  ;;  %v645_v28 = vmul.f32 %v1229_v26, %v1427_v24 }
  0xef   : > { %v493_v29 = vpop.f32.mrf.mxu0  ;;  %v557_v30 = vpop.f32.mrf.mxu1 }
  0xf0   : > { %v627_v32 = vmul.f32 %v1427_v24, %v493_v29  ;;  %v643_v33 = vmul.f32 %v1427_v24, %v557_v30  ;;  %v668_v38 = vadd.f32 %v1434_v31, %v629_v27  ;;  %v684_v39 = vadd.f32 %v1434_v31, %v645_v28 }
  0xf1   : > { %v1214_v34 = vpop.f32.mrf.mxu0  ;;  %v1230_v35 = vpop.f32.mrf.mxu1 }
  0xf2   : > { %v630_v36 = vmul.f32 %v1214_v34, %v1427_v24  ;;  %v646_v37 = vmul.f32 %v1230_v35, %v1427_v24  ;;  %v666_v46 = vadd.f32 %v1434_v31, %v627_v32  ;;  %v682_v47 = vadd.f32 %v1434_v31, %v643_v33 }
  0xf3   : > { %v496_v40 = vpop.f32.mrf.mxu0  ;;  %v560_v41 = vpop.f32.mrf.mxu1 }
  0xf4   : > { %v669_v42 = vadd.f32 %v1434_v31, %v630_v36  ;;  %v685_v43 = vadd.f32 %v1434_v31, %v646_v37  ;;  %v628_v44 = vmul.f32 %v1427_v24, %v496_v40  ;;  %v644_v45 = vmul.f32 %v1427_v24, %v560_v41 }
  0xf5   : > { %v1217_v48 = vpop.f32.mrf.mxu0  ;;  %v1233_v49 = vpop.f32.mrf.mxu1 }
  0xf6   : > { %v1084_v50 = vpack.c.bf16 %v669_v42, %v668_v38  ;;  %v1124_v51 = vpack.c.bf16 %v685_v43, %v684_v39  ;;  %v667_v52 = vadd.f32 %v1434_v31, %v628_v44  ;;  %v683_v53 = vadd.f32 %v1434_v31, %v644_v45 }
  0xf7   : > { %v633_v54 = vmul.f32 %v1217_v48, %v1427_v24  ;;  %v649_v55 = vmul.f32 %v1233_v49, %v1427_v24  ;;  %v509_v56 = vpop.f32.mrf.mxu0  ;;  %v573_v57 = vpop.f32.mrf.mxu1 }
  0xf8   : > { %1156 = vst [vmem:[%s1453_s24 + $0x8] sm:$0xff] %v1084_v50   ;;  %1164 = vst [vmem:[%s1453_s24 + $0x48] sm:$0xff] %v1124_v51   ;;  %v1079_v58 = vpack.c.bf16 %v667_v52, %v666_v46  ;;  %v1119_v59 = vpack.c.bf16 %v683_v53, %v682_v47  ;;  %v631_v60 = vmul.f32 %v1427_v24, %v509_v56 }
  0xf9   : > { %v647_v61 = vmul.f32 %v1427_v24, %v573_v57  ;;  %v1218_v62 = vpop.f32.mrf.mxu0  ;;  %v1234_v63 = vpop.f32.mrf.mxu1  ;;  %v672_v2 = vadd.f32 %v1434_v31, %v633_v54  ;;  %v688_v3 = vadd.f32 %v1434_v31, %v649_v55 }
  0xfa   : > { %1080 = vst [vmem:[%s1453_s24] sm:$0xff] %v1079_v58   ;;  %1163 = vst [vmem:[%s1453_s24 + $0x40] sm:$0xff] %v1119_v59   ;;  %v634_v0 = vmul.f32 %v1218_v62, %v1427_v24  ;;  %v650_v1 = vmul.f32 %v1234_v63, %v1427_v24  ;;  %v670_v10 = vadd.f32 %v1434_v31, %v631_v60 }
  0xfb   : > { %v512_v4 = vpop.f32.mrf.mxu0  ;;  %v576_v5 = vpop.f32.mrf.mxu1  ;;  %v686_v11 = vadd.f32 %v1434_v31, %v647_v61 }
  0xfc   : > { %v673_v6 = vadd.f32 %v1434_v31, %v634_v0  ;;  %v689_v7 = vadd.f32 %v1434_v31, %v650_v1  ;;  %v632_v8 = vmul.f32 %v1427_v24, %v512_v4  ;;  %v648_v9 = vmul.f32 %v1427_v24, %v576_v5 }
  0xfd   : > { %v1221_v12 = vpop.f32.mrf.mxu0  ;;  %v1237_v13 = vpop.f32.mrf.mxu1 }
  0xfe   : > { %v1094_v14 = vpack.c.bf16 %v673_v6, %v672_v2  ;;  %v1134_v15 = vpack.c.bf16 %v689_v7, %v688_v3  ;;  %v671_v16 = vadd.f32 %v1434_v31, %v632_v8  ;;  %v687_v17 = vadd.f32 %v1434_v31, %v648_v9 }
  0xff   : > { %v637_v18 = vmul.f32 %v1221_v12, %v1427_v24  ;;  %v653_v19 = vmul.f32 %v1237_v13, %v1427_v24  ;;  %v525_v20 = vpop.f32.mrf.mxu0  ;;  %v589_v21 = vpop.f32.mrf.mxu1 }
 0x100   : > { %1158 = vst [vmem:[%s1453_s24 + $0x18] sm:$0xff] %v1094_v14   ;;  %1166 = vst [vmem:[%s1453_s24 + $0x58] sm:$0xff] %v1134_v15   ;;  %v1089_v22 = vpack.c.bf16 %v671_v16, %v670_v10  ;;  %v1129_v23 = vpack.c.bf16 %v687_v17, %v686_v11  ;;  %v635_v25 = vmul.f32 %v1427_v24, %v525_v20 }
 0x101   : > { %v651_v26 = vmul.f32 %v1427_v24, %v589_v21  ;;  %v1222_v27 = vpop.f32.mrf.mxu0  ;;  %v1238_v28 = vpop.f32.mrf.mxu1  ;;  %v676_v32 = vadd.f32 %v1434_v31, %v637_v18  ;;  %v692_v33 = vadd.f32 %v1434_v31, %v653_v19 }
 0x102   : > { %1157 = vst [vmem:[%s1453_s24 + $0x10] sm:$0xff] %v1089_v22   ;;  %1165 = vst [vmem:[%s1453_s24 + $0x50] sm:$0xff] %v1129_v23   ;;  %v638_v29 = vmul.f32 %v1222_v27, %v1427_v24  ;;  %v654_v30 = vmul.f32 %v1238_v28, %v1427_v24  ;;  %v674_v40 = vadd.f32 %v1434_v31, %v635_v25 }
 0x103   : > { %v528_v34 = vpop.f32.mrf.mxu0  ;;  %v592_v35 = vpop.f32.mrf.mxu1  ;;  %v690_v41 = vadd.f32 %v1434_v31, %v651_v26 }
 0x104   : > { %v677_v36 = vadd.f32 %v1434_v31, %v638_v29  ;;  %v693_v37 = vadd.f32 %v1434_v31, %v654_v30  ;;  %v636_v38 = vmul.f32 %v1427_v24, %v528_v34  ;;  %v652_v39 = vmul.f32 %v1427_v24, %v592_v35 }
 0x105   : > { %v1225_v42 = vpop.f32.mrf.mxu0  ;;  %v1241_v43 = vpop.f32.mrf.mxu1 }
 0x106   : > { %v1104_v44 = vpack.c.bf16 %v677_v36, %v676_v32  ;;  %v1144_v45 = vpack.c.bf16 %v693_v37, %v692_v33  ;;  %v675_v46 = vadd.f32 %v1434_v31, %v636_v38  ;;  %v691_v47 = vadd.f32 %v1434_v31, %v652_v39 }
 0x107   : > { %v641_v48 = vmul.f32 %v1225_v42, %v1427_v24  ;;  %v657_v49 = vmul.f32 %v1241_v43, %v1427_v24  ;;  %v541_v50 = vpop.f32.mrf.mxu0  ;;  %v605_v51 = vpop.f32.mrf.mxu1 }
 0x108   : > { %1160 = vst [vmem:[%s1453_s24 + $0x28] sm:$0xff] %v1104_v44   ;;  %1168 = vst [vmem:[%s1453_s24 + $0x68] sm:$0xff] %v1144_v45   ;;  %v1099_v52 = vpack.c.bf16 %v675_v46, %v674_v40  ;;  %v1139_v53 = vpack.c.bf16 %v691_v47, %v690_v41  ;;  %v639_v54 = vmul.f32 %v1427_v24, %v541_v50 }
 0x109   : > { %v655_v55 = vmul.f32 %v1427_v24, %v605_v51  ;;  %v1226_v56 = vpop.f32.mrf.mxu0  ;;  %v1242_v57 = vpop.f32.mrf.mxu1  ;;  %v680_v60 = vadd.f32 %v1434_v31, %v641_v48  ;;  %v696_v61 = vadd.f32 %v1434_v31, %v657_v49 }
 0x10a   : > { %1159 = vst [vmem:[%s1453_s24 + $0x20] sm:$0xff] %v1099_v52   ;;  %1167 = vst [vmem:[%s1453_s24 + $0x60] sm:$0xff] %v1139_v53   ;;  %v642_v58 = vmul.f32 %v1226_v56, %v1427_v24  ;;  %v658_v59 = vmul.f32 %v1242_v57, %v1427_v24  ;;  %v678_v4 = vadd.f32 %v1434_v31, %v639_v54 }
 0x10b   : > { %v544_v62 = vpop.f32.mrf.mxu0  ;;  %v608_v63 = vpop.f32.mrf.mxu1  ;;  %v694_v5 = vadd.f32 %v1434_v31, %v655_v55 }
 0x10c   : > { %v681_v0 = vadd.f32 %v1434_v31, %v642_v58  ;;  %v697_v1 = vadd.f32 %v1434_v31, %v658_v59  ;;  %v640_v2 = vmul.f32 %v1427_v24, %v544_v62  ;;  %v656_v3 = vmul.f32 %v1427_v24, %v608_v63 }
 0x10e   : > { %v1114_v6 = vpack.c.bf16 %v681_v0, %v680_v60  ;;  %v1154_v7 = vpack.c.bf16 %v697_v1, %v696_v61  ;;  %v679_v8 = vadd.f32 %v1434_v31, %v640_v2  ;;  %v695_v9 = vadd.f32 %v1434_v31, %v656_v3 }
 0x110   : > { %1162 = vst [vmem:[%s1453_s24 + $0x38] sm:$0xff] %v1114_v6   ;;  %1170 = vst [vmem:[%s1453_s24 + $0x78] sm:$0xff] %v1154_v7   ;;  %v1109_v10 = vpack.c.bf16 %v679_v8, %v678_v4  ;;  %v1149_v11 = vpack.c.bf16 %v695_v9, %v694_v5 }
 0x112   : > { %1161 = vst [vmem:[%s1453_s24 + $0x30] sm:$0xff] %v1109_v10   ;;  %1169 = vst [vmem:[%s1453_s24 + $0x70] sm:$0xff] %v1149_v11  }
 0x113 PF: > { %s14_s17 = sadd.s32 1, %s1329_s17   ;;  %s1535_s15 = smov %s1325_s16 }
 0x114   : > { %p11_p5 = scmp.ge.s32.totalorder %s14_s17, 18   ;;  %s1536_s16 = smov %s1538_s18 }
 0x116   :  { %13 = sbr.rel (!%p11_p5) target bundleno = 2 (0x2), region = 75 }

</bundles_post_ra>
